<compile_context>
chip_gen: v7x
topology: tpu7x:2x2x1
jax: 0.10.0
libtpu: 0.0.40
codegen_flags: <defaults>
</compile_context>

<pallas_src>
import functools

import jax
import jax.numpy as jnp
from jax.experimental import pallas as pl
from jax.experimental.pallas import tpu as pltpu

BN_EPS = 1e-5
_LANE = 128
_TILE_VMEM_BUDGET = 24 << 20   # double-buffered per-step tile budget (safe on v7x 64 MiB VMEM)
_VMEM_LIMIT_BYTES = 48 << 20   # raise scoped VMEM limit (v5e default is 16 MiB)
_MAX_L_TILE = 8192


def _stats_kernel(x_ref, s_ref, g_ref, *, L, lt):
    """Per-batch column-sum and Gram matrix of X, accumulated across L tiles.

    x_ref: (1, C_in, lt)   s_ref: (1, C_in, 1)   g_ref: (1, C_in, C_in)
    Output blocks are per-batch (index map (n, 0, 0)), so they stay resident in
    VMEM across the inner (L) grid axis and are accumulated there.
    """
    @pl.when(pl.program_id(1) == 0)
    def _():
        s_ref[...] = jnp.zeros_like(s_ref)
        g_ref[...] = jnp.zeros_like(g_ref)

    x = x_ref[0].astype(jnp.float32)                         # (C_in, lt)
    if L % lt:
        # Ragged last tile: lanes past the end of L hold unspecified data —
        # zero them so the statistics stay exact (non-last tiles: mask is all-1).
        col = jax.lax.broadcasted_iota(jnp.int32, x.shape, 1)
        limit = L - pl.program_id(1) * lt
        x = jnp.where(col < limit, x, 0.0)

    s_ref[0] += jnp.sum(x, axis=1, keepdims=True)            # (C_in, 1)
    # Gram = X @ X^T, contracting the lane dim of both operands (no explicit .T).
    g_ref[0] += jax.lax.dot_general(
        x, x, (((1,), (1,)), ((), ())), preferred_element_type=jnp.float32)


def _matmul_affine_relu_kernel(x_ref, w_ref, shift_ref, o_ref):
    """o = relu(W_bn @ x + shift), NCL layout, L on the 128-lane axis.

    x_ref: (1, C_in, lt)  w_ref: (C_out, C_in)  shift_ref: (C_out, 1)
    o_ref: (1, C_out, lt).  Out-of-bounds columns of the last tile are dropped
    by Pallas on store, so no masking is needed here.
    """
    x = x_ref[0]                                              # (C_in, lt)
    y = jnp.dot(w_ref[...], x, preferred_element_type=jnp.float32)
    o_ref[0] = jnp.maximum(y + shift_ref[...], 0.0).astype(o_ref.dtype)


def _pick_l_tile(L, c_in, c_out, l_tile):
    """Largest L tile (multiple of 128) under the VMEM budget, minimal waste."""
    l128 = pl.cdiv(L, _LANE) * _LANE
    # Per-step bytes (pass 2 dominates): double-buffered f32 X-in + Y-out.
    bytes_per_col = 2 * 4 * (c_in + c_out)
    cap = (_TILE_VMEM_BUDGET // (bytes_per_col * _LANE)) * _LANE
    cap = max(_LANE, min(cap, _MAX_L_TILE))
    if l_tile is not None:                                    # explicit user cap
        cap = max(_LANE, min(cap, (l_tile // _LANE) * _LANE))
    if l128 <= cap:
        return l128                                           # one tile per batch
    # Balance tiles so the ragged tail wastes < ~128 columns per tile.
    num_l = pl.cdiv(l128, cap)
    return pl.cdiv(l128 // _LANE, num_l) * _LANE


@functools.partial(jax.jit, static_argnames=("l_tile",))
def conv_norm_act(x, conv_weight, gamma, beta, *, l_tile=None):
    """Forward of Conv_Norm_Act (Conv1d k=1, bias=False -> BN1d -> ReLU).

    Args:
      x:           (N, C_in, L)  float32, NCL layout (PyTorch convention).
      conv_weight: (C_out, C_in, 1)  Conv1d weight.
      gamma, beta: (C_out,) BatchNorm affine parameters.
      l_tile:      optional cap on the L-tile size (multiple of 128); by default
                   the tile is auto-sized against the VMEM budget.
    Returns:
      (N, C_out, L) float32.
    """
    N, C_in, L = x.shape
    C_out = conv_weight.shape[0]

    lt = _pick_l_tile(L, C_in, C_out, l_tile)
    num_l_tiles = pl.cdiv(L, lt)

    w = conv_weight[:, :, 0].astype(jnp.float32)              # (C_out, C_in)
    cparams = pltpu.CompilerParams(
        dimension_semantics=("parallel", "arbitrary"),
        vmem_limit_bytes=_VMEM_LIMIT_BYTES)

    # ---- pass 1: X-only BN statistics (colsum + Gram), per-batch partials ----
    s_parts, g_parts = pl.pallas_call(
        functools.partial(_stats_kernel, L=L, lt=lt),
        out_shape=(jax.ShapeDtypeStruct((N, C_in, 1), jnp.float32),
                   jax.ShapeDtypeStruct((N, C_in, C_in), jnp.float32)),
        grid=(N, num_l_tiles),
        in_specs=[pl.BlockSpec((1, C_in, lt), lambda n, l: (n, 0, l))],
        out_specs=[pl.BlockSpec((1, C_in, 1), lambda n, l: (n, 0, 0)),
                   pl.BlockSpec((1, C_in, C_in), lambda n, l: (n, 0, 0))],
        compiler_params=cparams,
        cost_estimate=pl.CostEstimate(
            flops=2 * N * L * C_in * C_in,
            transcendentals=0,
            bytes_accessed=4 * N * L * C_in),
    )(x)

    s = jnp.sum(s_parts[:, :, 0], axis=0)                     # (C_in,)
    g = jnp.sum(g_parts, axis=0)                              # (C_in, C_in)

    m = jnp.float32(N * L)
    mean = (w @ s) / m                                         # (C_out,)
    e_y2 = jnp.sum((w @ g) * w, axis=1) / m                    # diag(W G W^T) / M
    var = jnp.maximum(e_y2 - mean * mean, 0.0)                 # biased (training BN)
    scale = gamma.astype(jnp.float32) * jax.lax.rsqrt(var + BN_EPS)
    shift = (beta.astype(jnp.float32) - mean * scale).reshape(C_out, 1)
    w_bn = scale[:, None] * w                                  # fold BN scale into W

    # ---- pass 2: Y = relu(W_bn @ X + shift), written directly in NCL ----
    out = pl.pallas_call(
        _matmul_affine_relu_kernel,
        out_shape=jax.ShapeDtypeStruct((N, C_out, L), x.dtype),
        grid=(N, num_l_tiles),
        in_specs=[
            pl.BlockSpec((1, C_in, lt), lambda n, l: (n, 0, l)),
            pl.BlockSpec((C_out, C_in), lambda n, l: (0, 0)),
            pl.BlockSpec((C_out, 1), lambda n, l: (0, 0)),
        ],
        out_specs=pl.BlockSpec((1, C_out, lt), lambda n, l: (n, 0, l)),
        compiler_params=pltpu.CompilerParams(
            dimension_semantics=("parallel", "parallel"),
            vmem_limit_bytes=_VMEM_LIMIT_BYTES),
        cost_estimate=pl.CostEstimate(
            flops=2 * N * L * C_in * C_out,
            transcendentals=0,
            bytes_accessed=4 * N * L * (C_in + C_out)),
    )(x, w_bn, shift)

    return out


def _reference(x, conv_weight, gamma, beta):
    """Pure-JAX reference mirroring PyTorch semantics (training-mode BN)."""
    w = conv_weight[:, :, 0]                                   # (C_out, C_in)
    y = jnp.einsum("ncl,oc->nol", x, w)                        # Conv1d k=1
    mean = jnp.mean(y, axis=(0, 2), keepdims=True)
    var = jnp.mean((y - mean) ** 2, axis=(0, 2), keepdims=True)  # biased var
    y_hat = (y - mean) / jnp.sqrt(var + BN_EPS)
    out = y_hat * gamma[None, :, None] + beta[None, :, None]
    return jnp.maximum(out, 0.0)


if __name__ == "__main__":
    key = jax.random.PRNGKey(0)
    k_x, k_w, k_g, k_b = jax.random.split(key, 4)

    # Small but representative: L is NOT a multiple of 128, so the ragged-tile
    # (in-kernel mask / dropped OOB store) path is exercised.
    N, C_in, C_out, L = 2, 8, 16, 320

    x = jax.random.normal(k_x, (N, C_in, L), dtype=jnp.float32)
    conv_weight = 0.1 * jax.random.normal(k_w, (C_out, C_in, 1), dtype=jnp.float32)
    gamma = 1.0 + 0.1 * jax.random.normal(k_g, (C_out,), dtype=jnp.float32)
    beta = 0.1 * jax.random.normal(k_b, (C_out,), dtype=jnp.float32)

    ref = _reference(x, conv_weight, gamma, beta)

    # Auto-sized tile (single ragged tile per batch).
    out_auto = jax.block_until_ready(conv_norm_act(x, conv_weight, gamma, beta))
    assert out_auto.shape == (N, C_out, L)
    assert jnp.allclose(out_auto, ref, atol=1e-4, rtol=1e-4), "mismatch (auto tile)"

    # Forced small tile: multi-tile grid (3 L-tiles x 2 batches) + ragged tail.
    out_small = jax.block_until_ready(
        conv_norm_act(x, conv_weight, gamma, beta, l_tile=128))
    assert jnp.allclose(out_small, ref, atol=1e-4, rtol=1e-4), "mismatch (small tile)"

    print("KERNEL_OK")
</pallas_src>

<mosaic_0001>
module attributes {stable_mosaic.version = 11 : i64} {
  func.func @_stats_kernel(%arg0: i32, %arg1: i32, %arg2: memref<1x8x384xf32, #tpu.memory_space<vmem>>, %arg3: memref<1x8x1xf32, #tpu.memory_space<vmem>>, %arg4: memref<1x8x8xf32, #tpu.memory_space<vmem>>) attributes {dimension_semantics = [#tpu.dimension_semantics<parallel>, #tpu.dimension_semantics<arbitrary>], iteration_bounds = array<i64: 2, 1>, scalar_prefetch = 0 : i64, scratch_operands = 0 : i64, tpu.core_type = #tpu.core_type<tc>, window_params = [{transform_indices = @transform_0, window_bounds = array<i64: 1, 8, 384>}, {transform_indices = @transform_1, window_bounds = array<i64: 1, 8, 1>}, {transform_indices = @transform_2, window_bounds = array<i64: 1, 8, 8>}]} {
    %c0_i32 = arith.constant 0 : i32
    %0 = arith.cmpi eq, %arg1, %c0_i32 : i32
    %1 = arith.extui %0 : i1 to i32
    %c0_i32_0 = arith.constant 0 : i32
    %2 = arith.cmpi ne, %1, %c0_i32_0 : i32
    scf.if %2 {
      %cst_17 = arith.constant 0.000000e+00 : f32
      %27 = vector.broadcast %cst_17 : f32 to vector<1x8x1xf32>
      %c0_18 = arith.constant 0 : index
      %c0_19 = arith.constant 0 : index
      %c0_20 = arith.constant 0 : index
      %28 = vector.load %arg3[%c0_18, %c0_19, %c0_20] : memref<1x8x1xf32, #tpu.memory_space<vmem>>, vector<1x8x1xf32>
      tpu.vector_store %arg3[%c0_18, %c0_19, %c0_20], %27 {strides = array<i32>} : memref<1x8x1xf32, #tpu.memory_space<vmem>>, vector<1x8x1xf32>,
      %cst_21 = arith.constant 0.000000e+00 : f32
      %29 = vector.broadcast %cst_21 : f32 to vector<1x8x8xf32>
      %c0_22 = arith.constant 0 : index
      %c0_23 = arith.constant 0 : index
      %c0_24 = arith.constant 0 : index
      %30 = vector.load %arg4[%c0_22, %c0_23, %c0_24] : memref<1x8x8xf32, #tpu.memory_space<vmem>>, vector<1x8x8xf32>
      tpu.vector_store %arg4[%c0_22, %c0_23, %c0_24], %29 {strides = array<i32>} : memref<1x8x8xf32, #tpu.memory_space<vmem>>, vector<1x8x8xf32>,
    } else {
    }
    %c0 = arith.constant 0 : index
    %c0_1 = arith.constant 0 : index
    %c0_2 = arith.constant 0 : index
    %3 = vector.load %arg2[%c0, %c0_1, %c0_2] : memref<1x8x384xf32, #tpu.memory_space<vmem>>, vector<1x8x384xf32>
    %4 = vector.shape_cast %3 : vector<1x8x384xf32> to vector<8x384xf32>
    %5 = tpu.iota {dimensions = array<i32: 1>} : vector<8x384xi32>
    %c384_i32 = arith.constant 384 : i32
    %6 = arith.muli %arg1, %c384_i32 : i32
    %c320_i32 = arith.constant 320 : i32
    %7 = arith.subi %c320_i32, %6 : i32
    %8 = vector.broadcast %7 : i32 to vector<8x384xi32>
    %9 = arith.cmpi slt, %5, %8 : vector<8x384xi32>
    %cst = arith.constant 0.000000e+00 : f32
    %10 = vector.broadcast %cst : f32 to vector<8x384xf32>
    %11 = arith.select %9, %4, %10 : vector<8x384xi1>, vector<8x384xf32>
    %c0_3 = arith.constant 0 : index
    %c0_4 = arith.constant 0 : index
    %c0_5 = arith.constant 0 : index
    %12 = vector.load %arg3[%c0_3, %c0_4, %c0_5] : memref<1x8x1xf32, #tpu.memory_space<vmem>>, vector<1x8x1xf32>
    %13 = vector.shape_cast %12 : vector<1x8x1xf32> to vector<8x1xf32>
    %cst_6 = arith.constant dense<0.000000e+00> : vector<8xf32>
    %14 = vector.multi_reduction <add>, %11, %cst_6 [1] : vector<8x384xf32> to vector<8xf32>
    %15 = vector.shape_cast %14 : vector<8xf32> to vector<8x1xf32>
    %16 = arith.addf %13, %15 : vector<8x1xf32>
    %c0_7 = arith.constant 0 : index
    %c0_8 = arith.constant 0 : index
    %c0_9 = arith.constant 0 : index
    %17 = vector.load %arg3[%c0_7, %c0_8, %c0_9] : memref<1x8x1xf32, #tpu.memory_space<vmem>>, vector<1x8x1xf32>
    %18 = vector.shape_cast %17 : vector<1x8x1xf32> to vector<8x1xf32>
    %19 = vector.shape_cast %16 : vector<8x1xf32> to vector<1x8x1xf32>
    tpu.vector_store %arg3[%c0_7, %c0_8, %c0_9], %19 {strides = array<i32>} : memref<1x8x1xf32, #tpu.memory_space<vmem>>, vector<1x8x1xf32>,
    %c0_10 = arith.constant 0 : index
    %c0_11 = arith.constant 0 : index
    %c0_12 = arith.constant 0 : index
    %20 = vector.load %arg4[%c0_10, %c0_11, %c0_12] : memref<1x8x8xf32, #tpu.memory_space<vmem>>, vector<1x8x8xf32>
    %21 = vector.shape_cast %20 : vector<1x8x8xf32> to vector<8x8xf32>
    %cst_13 = arith.constant dense<0.000000e+00> : vector<8x8xf32>
    %22 = tpu.matmul %11, %11, %cst_13 {dimension_numbers = #tpu.dot_dimension_numbers<[1], [1], [0], [0], [0, 0, 1, 0], [], []>} : vector<8x384xf32>, vector<8x384xf32>, vector<8x8xf32> -> vector<8x8xf32>
    %23 = arith.addf %21, %22 : vector<8x8xf32>
    %c0_14 = arith.constant 0 : index
    %c0_15 = arith.constant 0 : index
    %c0_16 = arith.constant 0 : index
    %24 = vector.load %arg4[%c0_14, %c0_15, %c0_16] : memref<1x8x8xf32, #tpu.memory_space<vmem>>, vector<1x8x8xf32>
    %25 = vector.shape_cast %24 : vector<1x8x8xf32> to vector<8x8xf32>
    %26 = vector.shape_cast %23 : vector<8x8xf32> to vector<1x8x8xf32>
    tpu.vector_store %arg4[%c0_14, %c0_15, %c0_16], %26 {strides = array<i32>} : memref<1x8x8xf32, #tpu.memory_space<vmem>>, vector<1x8x8xf32>,
    return
  }
  func.func @transform_0(%arg0: i32, %arg1: i32) -> (i32, i32, i32) {
    %c0_i32 = arith.constant 0 : i32
    %c0_i32_0 = arith.constant 0 : i32
    return %arg0, %c0_i32, %arg1 : i32, i32, i32
  }
  func.func @transform_1(%arg0: i32, %arg1: i32) -> (i32, i32, i32) {
    %c0_i32 = arith.constant 0 : i32
    %c0_i32_0 = arith.constant 0 : i32
    %c0_i32_1 = arith.constant 0 : i32
    return %arg0, %c0_i32, %c0_i32_0 : i32, i32, i32
  }
  func.func @transform_2(%arg0: i32, %arg1: i32) -> (i32, i32, i32) {
    %c0_i32 = arith.constant 0 : i32
    %c0_i32_0 = arith.constant 0 : i32
    %c0_i32_1 = arith.constant 0 : i32
    return %arg0, %c0_i32, %c0_i32_0 : i32, i32, i32
  }
}

module attributes {stable_mosaic.version = 11 : i64} {
  func.func @_matmul_affine_relu_kernel(%arg0: i32, %arg1: i32, %arg2: memref<1x8x384xf32, #tpu.memory_space<vmem>>, %arg3: memref<16x8xf32, #tpu.memory_space<vmem>>, %arg4: memref<16x1xf32, #tpu.memory_space<vmem>>, %arg5: memref<1x16x384xf32, #tpu.memory_space<vmem>>) attributes {dimension_semantics = [#tpu.dimension_semantics<parallel>, #tpu.dimension_semantics<parallel>], iteration_bounds = array<i64: 2, 1>, scalar_prefetch = 0 : i64, scratch_operands = 0 : i64, tpu.core_type = #tpu.core_type<tc>, window_params = [{transform_indices = @transform_0, window_bounds = array<i64: 1, 8, 384>}, {pipeline_mode = #tpu.pipeline_mode<synchronous>, transform_indices = @transform_1, window_bounds = array<i64: 16, 8>}, {pipeline_mode = #tpu.pipeline_mode<synchronous>, transform_indices = @transform_2, window_bounds = array<i64: 16, 1>}, {transform_indices = @transform_3, window_bounds = array<i64: 1, 16, 384>}]} {
    %c0 = arith.constant 0 : index
    %c0_0 = arith.constant 0 : index
    %c0_1 = arith.constant 0 : index
    %0 = vector.load %arg2[%c0, %c0_0, %c0_1] : memref<1x8x384xf32, #tpu.memory_space<vmem>>, vector<1x8x384xf32>
    %1 = vector.shape_cast %0 : vector<1x8x384xf32> to vector<8x384xf32>
    %c0_2 = arith.constant 0 : index
    %c0_3 = arith.constant 0 : index
    %2 = vector.load %arg3[%c0_2, %c0_3] : memref<16x8xf32, #tpu.memory_space<vmem>>, vector<16x8xf32>
    %cst = arith.constant dense<0.000000e+00> : vector<16x384xf32>
    %3 = tpu.matmul %2, %1, %cst {dimension_numbers = #tpu.dot_dimension_numbers<[1], [0], [0], [1], [0, 0, 1, 1], [], []>} : vector<16x8xf32>, vector<8x384xf32>, vector<16x384xf32> -> vector<16x384xf32>
    %c0_4 = arith.constant 0 : index
    %c0_5 = arith.constant 0 : index
    %4 = vector.load %arg4[%c0_4, %c0_5] : memref<16x1xf32, #tpu.memory_space<vmem>>, vector<16x1xf32>
    %5 = vector.broadcast %4 : vector<16x1xf32> to vector<16x384xf32>
    %6 = arith.addf %3, %5 : vector<16x384xf32>
    %cst_6 = arith.constant 0.000000e+00 : f32
    %7 = vector.broadcast %cst_6 : f32 to vector<16x384xf32>
    %8 = arith.maximumf %6, %7 : vector<16x384xf32>
    %c0_7 = arith.constant 0 : index
    %c0_8 = arith.constant 0 : index
    %c0_9 = arith.constant 0 : index
    %9 = vector.load %arg5[%c0_7, %c0_8, %c0_9] : memref<1x16x384xf32, #tpu.memory_space<vmem>>, vector<1x16x384xf32>
    %10 = vector.shape_cast %9 : vector<1x16x384xf32> to vector<16x384xf32>
    %11 = vector.shape_cast %8 : vector<16x384xf32> to vector<1x16x384xf32>
    tpu.vector_store %arg5[%c0_7, %c0_8, %c0_9], %11 {strides = array<i32>} : memref<1x16x384xf32, #tpu.memory_space<vmem>>, vector<1x16x384xf32>,
    return
  }
  func.func @transform_0(%arg0: i32, %arg1: i32) -> (i32, i32, i32) {
    %c0_i32 = arith.constant 0 : i32
    %c0_i32_0 = arith.constant 0 : i32
    return %arg0, %c0_i32, %arg1 : i32, i32, i32
  }
  func.func @transform_1(%arg0: i32, %arg1: i32) -> (i32, i32) {
    %c0_i32 = arith.constant 0 : i32
    %c0_i32_0 = arith.constant 0 : i32
    %c0_i32_1 = arith.constant 0 : i32
    return %c0_i32, %c0_i32_0 : i32, i32
  }
  func.func @transform_2(%arg0: i32, %arg1: i32) -> (i32, i32) {
    %c0_i32 = arith.constant 0 : i32
    %c0_i32_0 = arith.constant 0 : i32
    %c0_i32_1 = arith.constant 0 : i32
    return %c0_i32, %c0_i32_0 : i32, i32
  }
  func.func @transform_3(%arg0: i32, %arg1: i32) -> (i32, i32, i32) {
    %c0_i32 = arith.constant 0 : i32
    %c0_i32_0 = arith.constant 0 : i32
    return %arg0, %c0_i32, %arg1 : i32, i32, i32
  }
}

</mosaic_0001>

<bundles_post_ra>
// kernel: conv_norm_act.2
= control target key start
LH: loop header
LB: loop body
LE: loop exit
PB: predicated region body
PF: predicated region fallthrough
CT: control target
= control target key end

     0   :  { %8 = vsyncpa [#allocation3], 0  ;;  %s774_s0 = inlined_call_operand.hbm [shape: f32[2,8,320], index: 0, kind: input, shape index: {}]   ;;  %s775_s1 = inlined_call_operand.vmem [shape: f32[2,8,1], index: 1, kind: output, shape index: {0}]   ;;  %s776_s2 = inlined_call_operand.vmem [shape: f32[2,8,8], index: 2, kind: output, shape index: {1}]  }
   0x1   :  { %10 = vsyncpa [#allocation3 + $0x1], 0  ;;  %s650_s9 = smov 0   ;;  %s652_s10 = smov 0  }
   0x2   :  { %s654_s11 = smov 0   ;;  %s656_s12 = smov 0  }
   0x3   :  { %s658_s13 = smov 0   ;;  %s660_s14 = smov 0  }
   0x4 LB: > { %s471_s15 = sadd.s32 4294967295, %s630_s14   ;;  %s28_s16 = sadd.s32 1, %s626_s13  ;;  %s630_s14 = sphi %s660_s14, %s16_s14   ;;  %s626_s13 = sphi %s658_s13, %s785_s13   ;;  %s622_s12 = sphi %s656_s12, %s784_s12   ;;  %s618_s11 = sphi %s654_s11, %s783_s11   ;;  %s614_s10 = sphi %s652_s10, %s782_s10   ;;  %s610_s9 = sphi %s650_s9, %s781_s9  }
   0x5   : > { %p30_p0 = scmp.ge.s32.totalorder %s28_s16, 2  ;;  %s37_s17 = sadd.s32 1, %s618_s11 }
   0x6   : > { %p44_p1 = scmp.ne.s32.totalorder %s618_s11, %s614_s10  ;;  %p45_p2 = scmp.eq.s32.totalorder %s630_s14, 0 }
   0x7   : > { %s787_s16 = smov (%p30_p0, %s28_s16), 0  ;;  %p50_p4 = scmp.ne.s32.totalorder %s614_s10, %s610_s9 }
   0x8   : > { %p46_p3 = por %p45_p2, %p44_p1  ;;  %s32_s18 = ssub.s32 %s626_s13, %s787_s16 }
   0x9   : > { %p51_p5 = scmp.eq.s32.totalorder %s471_s15, 0  ;;  %p35_p6 = scmp.eq.s32.totalorder %s32_s18, 0 }
   0xa   : > { %p499_p8 = scmp.lt.s32.totalorder %s630_s14, 2  ;;  %s126_s21 = sand.u32 1, %s618_s11  }
   0xb   : > { %p689_p7 = por %p51_p5, %p50_p4  ;;  %s491_s22 = smul.u32 384, %s626_s13 }
   0xc   : > { %s695_s20 = scalar_select %p35_p6, %s618_s11, %s37_s17  }
   0xd   : > { %s490_s23 = smul.u32 24, %s126_s21  ;;  %s702_s26 = scalar_lea.hbm %s774_s0, %s491_s22 }
   0xe   : > { %p704_p9 = pnand %p499_p8, %p46_p3  ;;  %s127_s30 = scalar_lea.sflag [#allocation3], %s126_s21 }
   0xf   : > { %s130_s28 = scalar_lea.vmem [#allocation2], %s490_s23  ;;  %s550_s3 = scalar_lea.hbm %s702_s26, 384 }
  0x10   : > { %s140_s29 = sshll.u32 %s130_s28, 4  ;;  %p551_p12 = scmp.ne.s32.totalorder %s702_s26, %s550_s3  ;;  %s709_s29 = int_to_ptr.vmem [resolvable:$true] %s140_s29 }
  0x11   : > { %p552_p13 = pneg %p704_p9  ;;  %s555_s6 = scalar_lea.hbm %s774_s0, 768 }
  0x12   : > { %p556_p2 = scmp.lt.u32.totalorder %s702_s26, %s774_s0  ;;  %p557_p3 = scmp.lt.u32.totalorder %s555_s6, %s550_s3 }
  0x13   : > { %p553_p0 = pnand %p552_p13, %p551_p12  ;;  %p559_p5 = scmp.lt.u32.totalorder %s550_s3, %s702_s26 }
  0x14   : > { %p558_p4 = por %p557_p3, %p556_p2 }
  0x15   : > { %p554_p1 = pneg %p553_p0 }
  0x16   : > { %p560_p6 = por %p559_p5, %p558_p4 }
  0x18   : > { %p561_p8 = pnand %p560_p6, %p554_p1 }
  0x1a   : > { %564 = shalt.err (!%p561_p8)
}
  0x1b   : > { %s565_s9 = scalar_lea.vmem %s709_s29, 384  ;;  %s632_s15 = smov [#allocation2]  }
  0x1c   : > { %p566_p12 = scmp.ne.s32.totalorder %s709_s29, %s565_s9  ;;  %s570_s17 = sshll.u32 %s632_s15, 4  ;;  %s571_s17 = int_to_ptr.vmem [resolvable:$false] %s570_s17 }
  0x1d   : > { %s572_s18 = scalar_lea.vmem %s571_s17, 768  ;;  %p573_p11 = scmp.lt.s32.totalorder %s709_s29, %s571_s17 }
  0x1e   : > { %p568_p0 = pnand %p566_p12, %p552_p13  ;;  %p574_p2 = scmp.lt.s32.totalorder %s572_s18, %s565_s9 }
  0x20   : > { %p569_p10 = pneg %p568_p0  ;;  %p575_p3 = por %p574_p2, %p573_p11 }
  0x22   : > { %p576_p4 = pnand %p575_p3, %p569_p10 }
  0x24   : > { %579 = shalt.err (!%p576_p4)
}
  0x25   : > { %498 = dma.hbm_to_vmem [thread:$0]  (!%p704_p9), %s702_s26, 384, %s709_s29, %s127_s30  }
  0x26   : > { %p779_p1 = scmp.lt.s32.totalorder %s630_s14, 3  ;;  %p780_p5 = scmp.ge.s32.totalorder %s630_s14, 1 }
  0x28   : > { %p146_p13 = pnand %p780_p5, %p779_p1 }
  0x29   : > { %s151_s21 = sand.u32 (!%p146_p13), 1, %s614_s10  }
  0x2a   : > { %149 = sbr.rel (%p146_p13) target bundleno = 277 (0x115), region = 24  ;;  %s152_s23 = scalar_lea.sflag (!%p146_p13), [#allocation3], %s151_s21 }
  0x2b   : > { %s492_s22 = smul.u32 (!%p146_p13), 24, %s151_s21 }
  0x2d   : > { %s155_s24 = scalar_lea.vmem (!%p146_p13), [#allocation2], %s492_s22 }
  0x31   : > { %605 = dma.done.wait (%p689_p7), %s152_s23, 384  }
  0x32   : > { %607 = vsyncadd (%p689_p7), %s152_s23, 4294966912  ;;  %v199_v0 = vlaneseq  ;;  %v633_v1 = vmov 0.0   ;;  %vm634_vm0 = vmmov 0   ;;  %v197_v4 = vld [vmem:[%s155_s24 + $0x8] sm:$0xff]  ;;  %v198_v5 = vld [vmem:[%s155_s24 + $0x10] sm:$0xff]  ;;  %p180_p7 = scmp.lt.s32.totalorder %s622_s12, 1 }
  0x33   : > { %485 = vmatprep.subr.mxu1 %v633_v1  ;;  %487 = vmatprep.mubr.msk.f32.mxu1 %vm634_vm0, %v633_v1  ;;  %v196_v6 = vld [vmem:[%s155_s24] sm:$0xff]  ;;  %vm194_vm2 = vcmask 64512   ;;  %vm192_vm3 = vcmask 7168  }
  0x34   : > { %v200_v2 = vand.u32 127, %v199_v0  ;;  %221 = vmatprep.subr.mxu0 %v197_v4  ;;  %v213_v8 = vadd.f32 %v197_v4, %v196_v6  ;;  %285 = vmatprep.mubr.f32.mxu0 %v197_v4  ;;  %s789_s12 = smov (!%p180_p7, %s622_s12), 1 }
  0x35   : > { %222 = vmatpush1.xpose.msra.mxu0 %v196_v6  ;;  %s477_s19 = sshll.u32 %s789_s12, 3 }
  0x36   : > { %v202_v3 = vadd.s32 256, %v200_v2  ;;  %s187_s27 = scalar_lea.vmem %s776_s2, %s477_s19  ;;  %s183_s30 = scalar_lea.vmem %s775_s1, %s477_s19 }
  0x37   : > { %195 = vst.msk [vmem:[%s187_s27] sm:$0xff] %vm194_vm2, %v633_v1 }
  0x38   : > { %vm208_vm1 = vcmp.lt.s32.totalorder %v202_v3, 320  ;;  %286 = vmatmul.mubr.f32.vlgmr.msra.gmra.mrb[0].mxu0 %v196_v6  ;;  %193 = vst.msk [vmem:[%s183_s30] sm:$0xff] %vm192_vm3, %v633_v1 }
  0x39   : > { %486 = vmatpush3.xpose.msk.msra.mxu1 %vm208_vm1, %v198_v5  ;;  %v211_v7 = vsel %vm208_vm1, %v198_v5, 0.0 }
  0x3a   : > { %v214_v9 = vadd.f32 %v213_v8, %v211_v7 }
  0x3c   : > { %488 = vmatmul.mubr.msk.f32.vlgmr.msra.gmra.mrb[0].mxu1 %vm208_vm1, %v198_v5  ;;  %215 = vadd.xlane.f32.xlu0 %v214_v9 }
  0x3e   : > { %v220_v14 = vld [vmem:[%s187_s27] sm:$0xff] }
  0x3f   : > { %v212_v10 = vld [vmem:[%s183_s30] sm:$0xff] }
  0xc9   : > { %v216_v11 = vpop.xlane.xlu0 %215 }
  0xca   : > { %v217_v12 = vadd.f32 %v216_v11, %v212_v10 }
  0xcc   : > { %219 = vst.msk [vmem:[%s183_s30] sm:$0xff] %vm192_vm3, %v217_v12 }
 0x10b   : > { %v287_v15 = vpop.f32.mrb[0].mxu0 }
 0x10c   : > { %v289_v18 = vpop.f32.mrb[1].mxu0 }
 0x10f   : > { %v357_v13 = vpop.f32.mrb[0].mxu1 }
 0x110   : > { %v489_v16 = vpop.f32.mrb[1].mxu1  ;;  %v358_v17 = vadd.f32 %v357_v13, %v287_v15 }
 0x112   : > { %v361_v19 = vadd.f32 %v358_v17, %v220_v14 }
 0x114   : > { %363 = vst.msk [vmem:[%s187_s27] sm:$0xff] %vm194_vm2, %v361_v19 }
 0x115 PF: > { %s16_s14 = sadd.s32 1, %s630_s14   ;;  %s781_s9 = smov %s614_s10 }
 0x116   : > { %p13_p9 = scmp.ge.s32.totalorder %s16_s14, 4   ;;  %s782_s10 = smov %s618_s11 }
 0x117   : > { %s783_s11 = smov %s695_s20  ;;  %s784_s12 = smov %s626_s13 }
 0x118   : > { %s785_s13 = smov %s787_s16  ;;  %15 = sbr.rel (!%p13_p9) target bundleno = 4 (0x4), region = 80 }
 0x11f   :  { %397 = vsyncpa [#allocation3], 1 }
 0x120   :  { %399 = vsyncpa [#allocation3 + $0x1], 1 }

// kernel: conv_norm_act.3
= control target key start
LH: loop header
LB: loop body
LE: loop exit
PB: predicated region body
PF: predicated region fallthrough
CT: control target
= control target key end

     0   :  { %8 = vsyncpa [#allocation3], 0  ;;  %s807_s0 = inlined_call_operand.vmem [shape: f32[2,8,320], index: 0, kind: input, shape index: {}]   ;;  %s808_s1 = inlined_call_operand.vmem [shape: f32[16,8], index: 1, kind: input, shape index: {}]   ;;  %s809_s2 = inlined_call_operand.vmem [shape: f32[16,1], index: 2, kind: input, shape index: {}]   ;;  %s810_s3 = inlined_call_operand.hbm [shape: f32[2,16,320], index: 3, kind: output, shape index: {}]  }
   0x1   :  { %10 = vsyncpa [#allocation3 + $0x1], 0  ;;  %s672_s12 = smov 0   ;;  %s674_s13 = smov 0  }
   0x2   :  { %s676_s14 = smov 0   ;;  %s678_s15 = smov 0  }
   0x3   :  { %s680_s16 = smov 0   ;;  %s682_s17 = smov 0  }
   0x4 LB: > { %s483_s18 = sadd.s32 4294967295, %s645_s17   ;;  %s484_s19 = sadd.s32 4294967294, %s645_s17   ;;  %s645_s17 = sphi %s682_s17, %s16_s17   ;;  %s641_s16 = sphi %s680_s16, %s817_s16   ;;  %s637_s15 = sphi %s678_s15, %s816_s15   ;;  %s633_s14 = sphi %s676_s14, %s815_s14   ;;  %s629_s13 = sphi %s674_s13, %s814_s13   ;;  %s625_s12 = sphi %s672_s12, %s813_s12  }
   0x5   : > { %s28_s20 = sadd.s32 1, %s641_s16  ;;  %s107_s21 = sadd.s32 1, %s633_s14 }
   0x6   : > { %p30_p0 = scmp.ge.s32.totalorder %s28_s20, 2  ;;  %p117_p1 = scmp.ne.s32.totalorder %s633_s14, %s629_s13 }
   0x7   : > { %p118_p2 = scmp.eq.s32.totalorder %s483_s18, 1  ;;  %p123_p3 = scmp.ne.s32.totalorder %s629_s13, %s625_s12 }
   0x8   : > { %s819_s20 = smov (%p30_p0, %s28_s20), 0  ;;  %p124_p5 = scmp.eq.s32.totalorder %s484_s19, 1 }
   0x9   : > { %p712_p4 = por %p118_p2, %p117_p1  ;;  %s102_s23 = ssub.s32 %s641_s16, %s819_s20 }
   0xa   : > { %p487_p6 = scmp.ge.s32.totalorder %s645_s17, 1  ;;  %p105_p7 = scmp.eq.s32.totalorder %s102_s23, 0 }
   0xb   : > { %p719_p8 = por %p124_p5, %p123_p3  ;;  %p161_p9 = scmp.lt.s32.totalorder %s645_s17, 3 }
   0xc   : > { %s725_s25 = scalar_select %p105_p7, %s633_s14, %s107_s21  }
   0xd   : > { %p162_p10 = pnand %p487_p6, %p161_p9 }
   0xe   : > { %p190_p11 = scmp.lt.s32.totalorder (!%p162_p10), %s637_s15, 1  ;;  %v203_v0 = vld [vmem:[%s808_s1] sm:$0xff] (!%p162_p10)  ;;  %vm217_vm0 = vcmask (!%p162_p10), 64512   ;;  %v647_v1 = vmov (!%p162_p10), 0.0   ;;  %v648_v3 = vmov (!%p162_p10), 0   ;;  %v206_v4 = vld [vmem:[%s809_s2 + $0x8] sm:$0xff] (!%p162_p10) }
   0xf   : > { %165 = sbr.rel (%p162_p10) target bundleno = 266 (0x10a), region = 32  ;;  %288 = vmatprep.mubr.f32.mxu0 (!%p162_p10), %v647_v1  ;;  %501 = vmatprep.mubr.msk.f32.mxu1 (!%p162_p10), %vm217_vm0, %v203_v0  ;;  %v205_v2 = vld [vmem:[%s809_s2] sm:$0xff] (!%p162_p10)  ;;  %v204_v5 = vld [vmem:[%s808_s1 + $0x8] sm:$0xff] (!%p162_p10)  ;;  %s186_s18 = sand.u32 (!%p162_p10), 1, %s629_s13  }
  0x10   : > { %566 = vset.pattern.permute.xlu0 (!%p162_p10), %v648_v3  ;;  %s504_s19 = smul.u32 (!%p162_p10), 48, %s186_s18  ;;  %s761_s29 = scalar_lea.sflag (!%p162_p10), [#allocation3], %s186_s18 }
  0x11   : > { %209 = vperm.xlu0 (!%p162_p10), %566, %v205_v2   ;;  %s506_s21 = smul.u32 (!%p162_p10), 768, %s637_s15 }
  0x12   : > { %s188_s23 = scalar_lea.vmem (!%p162_p10), [#allocation2], %s504_s19 }
  0x13   : > { %s404_s26 = sshll.u32 (!%p162_p10), %s188_s23, 4  ;;  %s757_s28 = scalar_lea.hbm (!%p162_p10), %s810_s3, %s506_s21  ;;  %s752_s26 = int_to_ptr.vmem [resolvable:$true] %s404_s26 }
  0x15   : > { %214 = vperm.xlu0 (!%p162_p10), %566, %v206_v4  }
  0x16   : > { %s191_s30 = scalar_select %p190_p11, %s637_s15, 1 }
  0x18   : > { %s505_s4 = smul.u32 24, %s191_s30  ;;  %s567_s30 = scalar_lea.vmem %s752_s26, 768 }
  0x19   : > { %p568_p12 = scmp.ne.s32.totalorder %s752_s26, %s567_s30 }
  0x1a   : > { %s197_s9 = scalar_lea.vmem %s807_s0, %s505_s4  ;;  %s649_s4 = smov [#allocation2]  }
  0x1b   : > { %v201_v6 = vld [vmem:[%s197_s9 + $0x8] sm:$0xff]  ;;  %v202_v7 = vld [vmem:[%s197_s9 + $0x10] sm:$0xff]  ;;  %v200_v8 = vld [vmem:[%s197_s9] sm:$0xff]  ;;  %p569_p13 = pnand %p568_p12, %p712_p4  ;;  %s571_s5 = sshll.u32 %s649_s4, 4  ;;  %s572_s5 = int_to_ptr.vmem [resolvable:$false] %s571_s5 }
  0x1c   : > { %224 = vmatprep.subr.mxu0 %v201_v6  ;;  %499 = vmatprep.subr.mxu1 %v202_v7  ;;  %s573_s6 = scalar_lea.vmem %s572_s5, 1536  ;;  %p574_p1 = scmp.lt.s32.totalorder %s752_s26, %s572_s5 }
  0x1d   : > { %225 = vmatpush1.msra.mxu0 %v200_v8  ;;  %500 = vmatpush3.msra.mxu1 %v202_v7  ;;  %p570_p0 = pneg %p569_p13  ;;  %p575_p2 = scmp.lt.s32.totalorder %s573_s6, %s567_s30 }
  0x1e   : > { %489 = vmatmul.mubr.msk.f32.vlgmr.msra.gmra.mrb[0].mxu0 %vm217_vm0, %v203_v0  ;;  %502 = vmatmul.mubr.msk.f32.vlgmr.msra.gmra.mrb[0].mxu1 %vm217_vm0, %v204_v5 }
  0x1f   : > { %294 = vmatprep.mubr.f32.mxu0 %v647_v1  ;;  %p576_p3 = por %p575_p2, %p574_p1 }
  0x21   : > { %p577_p5 = pnand %p576_p3, %p570_p0 }
  0x22   : > { %490 = vmatmul.mubr.msk.f32.gmra.mrb[2].mxu0 %vm217_vm0, %v204_v5 }
  0x90   : > { %v210_v9 = vpop.permute.xlu0 %209 }
  0x94   : > { %v215_v10 = vpop.permute.xlu0 %214 }
  0xf1   : > { %v290_v11 = vpop.f32.mrb[0].mxu0  ;;  %v503_v12 = vpop.f32.mrb[0].mxu1 }
  0xf2   : > { %v291_v13 = vadd.f32 %v290_v11, %v210_v9  ;;  %v373_v14 = vadd.f32 %v503_v12, %v215_v10  ;;  %v292_v15 = vpop.f32.mrb[1].mxu0  ;;  %v367_v16 = vpop.f32.mrb[1].mxu1 }
  0xf3   : > { %v293_v17 = vadd.f32 %v292_v15, %v210_v9  ;;  %v368_v18 = vadd.f32 %v367_v16, %v210_v9 }
  0xf4   : > { %v376_v19 = vmax.f32 %v291_v13, 0.0  ;;  %v381_v20 = vmax.f32 %v373_v14, 0.0 }
  0xf5   : > { %v377_v21 = vmax.f32 %v293_v17, 0.0  ;;  %v378_v22 = vmax.f32 %v368_v18, 0.0  ;;  %v296_v23 = vpop.f32.mrb[2].mxu0 }
  0xf6   : > { %382 = vst [vmem:[%s188_s23] sm:$0xff] %v376_v19  ;;  %387 = vst [vmem:[%s188_s23 + $0x28] sm:$0xff] %v381_v20  ;;  %v297_v24 = vadd.f32 %v296_v23, %v215_v10  ;;  %v298_v25 = vpop.f32.mrb[3].mxu0 }
  0xf7   : > { %383 = vst [vmem:[%s188_s23 + $0x8] sm:$0xff] %v377_v21  ;;  %384 = vst [vmem:[%s188_s23 + $0x10] sm:$0xff] %v378_v22  ;;  %v299_v26 = vadd.f32 %v298_v25, %v215_v10 }
  0xf8   : > { %v379_v27 = vmax.f32 %v297_v24, 0.0 }
  0xf9   : > { %v380_v28 = vmax.f32 %v299_v26, 0.0 }
  0xfa   : > { %385 = vst [vmem:[%s188_s23 + $0x18] sm:$0xff] %v379_v27 }
  0xfb   : > { %386 = vst [vmem:[%s188_s23 + $0x20] sm:$0xff] %v380_v28 }
  0xfc   : > { %580 = shalt.err (!%p577_p5)
}
  0xfd   : > { %s581_s7 = scalar_lea.hbm %s757_s28, 768  ;;  %s585_s10 = scalar_lea.hbm %s810_s3, 1536 }
  0xfe   : > { %p582_p6 = scmp.ne.s32.totalorder %s757_s28, %s581_s7  ;;  %p586_p10 = scmp.lt.u32.totalorder %s757_s28, %s810_s3 }
  0xff   : > { %p587_p11 = scmp.lt.u32.totalorder %s585_s10, %s581_s7  ;;  %p589_p13 = scmp.lt.u32.totalorder %s581_s7, %s757_s28 }
 0x100   : > { %p583_p7 = pnand %p582_p6, %p712_p4 }
 0x101   : > { %p588_p12 = por %p587_p11, %p586_p10 }
 0x102   : > { %p584_p9 = pneg %p583_p7 }
 0x103   : > { %p590_p0 = por %p589_p13, %p588_p12 }
 0x105   : > { %p591_p1 = pnand %p590_p0, %p584_p9 }
 0x107   : > { %594 = shalt.err (!%p591_p1)
}
 0x108   : > { %s650_s19 = smov 384   ;;  %s651_s21 = smov 24  }
 0x109   : > { %507 = dma.vmem_to_hbm [thread:$0]  (%p712_p4), %s752_s26, 768, %s757_s28, %s761_s29, %s650_s19, %s650_s19, %s651_s21  }
 0x10a PF: > { %p513_p2 = scmp.ge.s32.totalorder %s645_s17, 2  ;;  %s419_s23 = sand.u32 1, %s625_s12  }
 0x10b   : > { %s420_s15 = scalar_lea.sflag [#allocation3], %s419_s23 }
 0x10c   : > { %p510_p3 = pnand %p513_p2, %p719_p8 }
 0x10e   : > { %620 = dma.done.wait (!%p510_p3), %s420_s15, 768  }
 0x10f   : > { %622 = vsyncadd (!%p510_p3), %s420_s15, 4294966528  ;;  %s16_s17 = sadd.s32 1, %s645_s17   ;;  %s813_s12 = smov %s629_s13 }
 0x110   : > { %p13_p5 = scmp.ge.s32.totalorder %s16_s17, 4   ;;  %s814_s13 = smov %s633_s14 }
 0x111   : > { %s815_s14 = smov %s725_s25  ;;  %s816_s15 = smov %s641_s16 }
 0x112   : > { %s817_s16 = smov %s819_s20  ;;  %15 = sbr.rel (!%p13_p5) target bundleno = 4 (0x4), region = 67 }
 0x119   :  { %425 = vsyncpa [#allocation3], 1 }
 0x11a   :  { %427 = vsyncpa [#allocation3 + $0x1], 1 }

</bundles_post_ra>
